<compile_context>
chip_gen: v7x
topology: tpu7x:2x2x1
jax: 0.10.0
libtpu: 0.0.40
codegen_flags: <defaults>
</compile_context>

<pallas_src>
import jax
import jax.numpy as jnp
from jax.experimental import pallas as pl
from jax.experimental.pallas import tpu as pltpu


def rsa_kernel(x_ref, w_ref, b_ref, o_ref):
    # x_ref: (1, C, N) block for one batch element.
    # w_ref: (Ctot, C) bf16 fused [Wq_pad; Wk_pad; gamma*Wv] weights.
    # b_ref: (Ctot, 1) f32 fused biases (gamma folded into the V rows).
    x = x_ref[0]                                                     # (C, N) f32
    c = x.shape[0]
    cq = (w_ref.shape[0] - c) // 2                                   # padded q/k channels

    # Fused 1x1 Q/K/V projection: one bf16 MXU pass, f32 accumulate.
    qkv = jnp.dot(w_ref[...], x.astype(jnp.bfloat16),
                  preferred_element_type=jnp.float32) + b_ref[...]  # (Ctot, N)
    q = qkv[:cq]                                                     # (Cq_pad, N)
    k = qkv[cq:2 * cq]                                               # (Cq_pad, N)
    v = qkv[2 * cq:]                                                 # (C, N), gamma pre-scaled

    # energy[j, i] = <k_j, q_i>  ->  (N_kv, N_q); only the tiny (Cq_pad, N)
    # k tile is transposed.  Softmax over the kv axis (axis 0).
    energy = jnp.dot(k.T.astype(jnp.bfloat16), q.astype(jnp.bfloat16),
                     preferred_element_type=jnp.float32)             # (N, N) f32
    m = jnp.max(energy, axis=0, keepdims=True)                       # (1, N)
    p = jnp.exp(energy - m)                                          # f32 softmax
    s = jnp.sum(p, axis=0, keepdims=True)                            # (1, N)
    attn = p * pl.reciprocal(s, approx=True)                         # (N_kv, N_q)

    # out[c, i] = sum_j v[c, j] * attn[j, i]   (gamma already folded into v)
    out = jnp.dot(v.astype(jnp.bfloat16), attn.astype(jnp.bfloat16),
                  preferred_element_type=jnp.float32)                # (C, N)

    o_ref[0] = out + x


@jax.jit
def fmap_fc_discriminator(x_nchw, params):
    """x_nchw: (B, C, H, W) float32. Returns (B, C, H, W)."""
    wq, bq, wk, bk, wv, bv, gamma = params
    B, C, H, W = x_nchw.shape
    N = H * W
    Cq = wq.shape[0]
    Cq_pad = max(8, -(-Cq // 8) * 8)        # pad q/k channels to a sublane multiple

    def pad_qk(w, b):
        wp = jnp.zeros((Cq_pad, C), w.dtype).at[:Cq, :].set(w)
        bp = jnp.zeros((Cq_pad,), b.dtype).at[:Cq].set(b)
        return wp, bp

    wq_p, bq_p = pad_qk(wq, bq)
    wk_p, bk_p = pad_qk(wk, bk)
    wv_s = gamma * wv                        # fold gamma into the V projection
    bv_s = gamma * bv

    w_all = jnp.concatenate([wq_p, wk_p, wv_s], axis=0)              # (Ctot, C)
    b_all = jnp.concatenate([bq_p, bk_p, bv_s], axis=0)[:, None]     # (Ctot, 1)
    Ctot = 2 * Cq_pad + C

    x_flat = x_nchw.reshape(B, C, N)         # NCHW-native: no transpose needed

    out_flat = pl.pallas_call(
        rsa_kernel,
        out_shape=jax.ShapeDtypeStruct((B, C, N), jnp.float32),
        grid=(B,),
        in_specs=[
            pl.BlockSpec((1, C, N), lambda b: (b, 0, 0)),            # x
            pl.BlockSpec((Ctot, C), lambda b: (0, 0)),               # fused W (bf16)
            pl.BlockSpec((Ctot, 1), lambda b: (0, 0)),               # fused bias (f32)
        ],
        out_specs=pl.BlockSpec((1, C, N), lambda b: (b, 0, 0)),
        compiler_params=pltpu.CompilerParams(dimension_semantics=("parallel",)),
    )(x_flat, w_all.astype(jnp.bfloat16), b_all.astype(jnp.float32))

    return out_flat.reshape(B, C, H, W)


def rsa_reference(x, wq, bq, wk, bk, wv, bv, gamma):
    """Pure-JAX reference matching the PyTorch rsaBlock semantics exactly."""
    B, C, H, W = x.shape
    N = H * W

    def conv1x1(x, w, b):
        return jnp.einsum('bchw,oc->bohw', x, w) + b[None, :, None, None]

    q = conv1x1(x, wq, bq).reshape(B, -1, N).transpose(0, 2, 1)      # (B, N, Cq)
    k = conv1x1(x, wk, bk).reshape(B, -1, N)                         # (B, Cq, N)
    v = conv1x1(x, wv, bv).reshape(B, -1, N)                         # (B, C, N)
    energy = jnp.einsum('bnc,bcm->bnm', q, k)                        # (B, N, N)
    attn = jax.nn.softmax(energy, axis=-1)
    out = jnp.einsum('bcj,bij->bci', v, attn).reshape(B, C, H, W)
    return gamma * out + x


if __name__ == "__main__":
    B, C, H, W = 2, 16, 16, 16   # in_channal = 16
    Cq = C // 8

    key = jax.random.PRNGKey(0)
    k_x, k_wq, k_bq, k_wk, k_bk, k_wv, k_bv = jax.random.split(key, 7)

    x = jax.random.normal(k_x, (B, C, H, W), dtype=jnp.float32)
    wq = 0.1 * jax.random.normal(k_wq, (Cq, C), dtype=jnp.float32)
    bq = 0.1 * jax.random.normal(k_bq, (Cq,), dtype=jnp.float32)
    wk = 0.1 * jax.random.normal(k_wk, (Cq, C), dtype=jnp.float32)
    bk = 0.1 * jax.random.normal(k_bk, (Cq,), dtype=jnp.float32)
    wv = 0.1 * jax.random.normal(k_wv, (C, C), dtype=jnp.float32)
    bv = 0.1 * jax.random.normal(k_bv, (C,), dtype=jnp.float32)
    # PyTorch inits gamma to 0 (identity block); use a nonzero deterministic
    # value so the attention path is actually exercised.
    gamma = jnp.array(0.5, dtype=jnp.float32)

    params = (wq, bq, wk, bk, wv, bv, gamma)

    out = fmap_fc_discriminator(x, params)
    jax.block_until_ready(out)

    ref = rsa_reference(x, wq, bq, wk, bk, wv, bv, gamma)
    assert out.shape == (B, C, H, W)
    # Tolerance sized for the bf16 MXU-operand path (reference itself uses
    # default TPU matmul precision).
    err = jnp.max(jnp.abs(out - ref))
    assert jnp.allclose(out, ref, atol=2e-2, rtol=2e-2), f"max abs err = {err}"

    print("KERNEL_OK")
</pallas_src>

<mosaic_0001>
module attributes {stable_mosaic.version = 11 : i64} {
  func.func @rsa_kernel(%arg0: i32, %arg1: memref<1x16x256xf32, #tpu.memory_space<vmem>>, %arg2: memref<32x16xbf16, #tpu.memory_space<vmem>>, %arg3: memref<32x1xf32, #tpu.memory_space<vmem>>, %arg4: memref<1x16x256xf32, #tpu.memory_space<vmem>>) attributes {dimension_semantics = [#tpu.dimension_semantics<parallel>], iteration_bounds = array<i64: 2>, scalar_prefetch = 0 : i64, scratch_operands = 0 : i64, tpu.core_type = #tpu.core_type<tc>, window_params = [{transform_indices = @transform_0, window_bounds = array<i64: 1, 16, 256>}, {pipeline_mode = #tpu.pipeline_mode<synchronous>, transform_indices = @transform_1, window_bounds = array<i64: 32, 16>}, {pipeline_mode = #tpu.pipeline_mode<synchronous>, transform_indices = @transform_2, window_bounds = array<i64: 32, 1>}, {transform_indices = @transform_3, window_bounds = array<i64: 1, 16, 256>}]} {
    %c0 = arith.constant 0 : index
    %c0_0 = arith.constant 0 : index
    %c0_1 = arith.constant 0 : index
    %0 = vector.load %arg1[%c0, %c0_0, %c0_1] : memref<1x16x256xf32, #tpu.memory_space<vmem>>, vector<1x16x256xf32>
    %1 = vector.shape_cast %0 : vector<1x16x256xf32> to vector<16x256xf32>
    %c0_2 = arith.constant 0 : index
    %c0_3 = arith.constant 0 : index
    %2 = vector.load %arg2[%c0_2, %c0_3] : memref<32x16xbf16, #tpu.memory_space<vmem>>, vector<32x16xbf16>
    %3 = arith.truncf %1 : vector<16x256xf32> to vector<16x256xbf16>
    %cst = arith.constant dense<0.000000e+00> : vector<32x256xf32>
    %4 = tpu.matmul %2, %3, %cst {dimension_numbers = #tpu.dot_dimension_numbers<[1], [0], [0], [1], [0, 0, 1, 1], [], []>} : vector<32x16xbf16>, vector<16x256xbf16>, vector<32x256xf32> -> vector<32x256xf32>
    %c0_4 = arith.constant 0 : index
    %c0_5 = arith.constant 0 : index
    %5 = vector.load %arg3[%c0_4, %c0_5] : memref<32x1xf32, #tpu.memory_space<vmem>>, vector<32x1xf32>
    %6 = vector.broadcast %5 : vector<32x1xf32> to vector<32x256xf32>
    %7 = arith.addf %4, %6 : vector<32x256xf32>
    %8 = vector.extract_strided_slice %7 {offsets = [0, 0], sizes = [8, 256], strides = [1, 1]} : vector<32x256xf32> to vector<8x256xf32>
    %9 = vector.extract_strided_slice %7 {offsets = [8, 0], sizes = [8, 256], strides = [1, 1]} : vector<32x256xf32> to vector<8x256xf32>
    %10 = vector.extract_strided_slice %7 {offsets = [16, 0], sizes = [16, 256], strides = [1, 1]} : vector<32x256xf32> to vector<16x256xf32>
    %11 = tpu.transpose %9, [1, 0] : vector<8x256xf32> -> vector<256x8xf32>
    %12 = arith.truncf %11 : vector<256x8xf32> to vector<256x8xbf16>
    %13 = arith.truncf %8 : vector<8x256xf32> to vector<8x256xbf16>
    %cst_6 = arith.constant dense<0.000000e+00> : vector<256x256xf32>
    %14 = tpu.matmul %12, %13, %cst_6 {dimension_numbers = #tpu.dot_dimension_numbers<[1], [0], [0], [1], [0, 0, 1, 1], [], []>} : vector<256x8xbf16>, vector<8x256xbf16>, vector<256x256xf32> -> vector<256x256xf32>
    %cst_7 = arith.constant dense<0xFF800000> : vector<256xf32>
    %15 = vector.multi_reduction <maximumf>, %14, %cst_7 [0] : vector<256x256xf32> to vector<256xf32>
    %16 = vector.shape_cast %15 : vector<256xf32> to vector<1x256xf32>
    %17 = vector.broadcast %16 : vector<1x256xf32> to vector<256x256xf32>
    %18 = arith.subf %14, %17 : vector<256x256xf32>
    %19 = math.exp %18 : vector<256x256xf32>
    %cst_8 = arith.constant dense<0.000000e+00> : vector<256xf32>
    %20 = vector.multi_reduction <add>, %19, %cst_8 [0] : vector<256x256xf32> to vector<256xf32>
    %21 = vector.shape_cast %20 : vector<256xf32> to vector<1x256xf32>
    %22 = tpu.reciprocal %21 {approx = true} : vector<1x256xf32> -> vector<1x256xf32>
    %23 = vector.broadcast %22 : vector<1x256xf32> to vector<256x256xf32>
    %24 = arith.mulf %19, %23 : vector<256x256xf32>
    %25 = arith.truncf %10 : vector<16x256xf32> to vector<16x256xbf16>
    %26 = arith.truncf %24 : vector<256x256xf32> to vector<256x256xbf16>
    %cst_9 = arith.constant dense<0.000000e+00> : vector<16x256xf32>
    %27 = tpu.matmul %25, %26, %cst_9 {dimension_numbers = #tpu.dot_dimension_numbers<[1], [0], [0], [1], [0, 0, 1, 1], [], []>} : vector<16x256xbf16>, vector<256x256xbf16>, vector<16x256xf32> -> vector<16x256xf32>
    %28 = arith.addf %27, %1 : vector<16x256xf32>
    %c0_10 = arith.constant 0 : index
    %c0_11 = arith.constant 0 : index
    %c0_12 = arith.constant 0 : index
    %29 = vector.load %arg4[%c0_10, %c0_11, %c0_12] : memref<1x16x256xf32, #tpu.memory_space<vmem>>, vector<1x16x256xf32>
    %30 = vector.shape_cast %29 : vector<1x16x256xf32> to vector<16x256xf32>
    %31 = vector.shape_cast %28 : vector<16x256xf32> to vector<1x16x256xf32>
    tpu.vector_store %arg4[%c0_10, %c0_11, %c0_12], %31 {strides = array<i32>} : memref<1x16x256xf32, #tpu.memory_space<vmem>>, vector<1x16x256xf32>,
    return
  }
  func.func @transform_0(%arg0: i32) -> (i32, i32, i32) {
    %c0_i32 = arith.constant 0 : i32
    %c0_i32_0 = arith.constant 0 : i32
    %c0_i32_1 = arith.constant 0 : i32
    return %arg0, %c0_i32, %c0_i32_0 : i32, i32, i32
  }
  func.func @transform_1(%arg0: i32) -> (i32, i32) {
    %c0_i32 = arith.constant 0 : i32
    %c0_i32_0 = arith.constant 0 : i32
    %c0_i32_1 = arith.constant 0 : i32
    return %c0_i32, %c0_i32_0 : i32, i32
  }
  func.func @transform_2(%arg0: i32) -> (i32, i32) {
    %c0_i32 = arith.constant 0 : i32
    %c0_i32_0 = arith.constant 0 : i32
    %c0_i32_1 = arith.constant 0 : i32
    return %c0_i32, %c0_i32_0 : i32, i32
  }
  func.func @transform_3(%arg0: i32) -> (i32, i32, i32) {
    %c0_i32 = arith.constant 0 : i32
    %c0_i32_0 = arith.constant 0 : i32
    %c0_i32_1 = arith.constant 0 : i32
    return %arg0, %c0_i32, %c0_i32_0 : i32, i32, i32
  }
}

</mosaic_0001>

<bundles_post_ra>
// kernel: fmap_fc_discriminator.1
= control target key start
LH: loop header
LB: loop body
LE: loop exit
PB: predicated region body
PF: predicated region fallthrough
CT: control target
= control target key end

     0   :  { %s1361_s12 = smov 0   ;;  %s2348_s0 = inlined_call_operand.vmem [shape: f32[2,16,256], index: 0, kind: input, shape index: {}]   ;;  %s2349_s1 = inlined_call_operand.vmem [shape: bf16[32,16], index: 1, kind: input, shape index: {}]   ;;  %s2350_s2 = inlined_call_operand.vmem [shape: f32[32,1], index: 2, kind: input, shape index: {}]   ;;  %s2351_s3 = inlined_call_operand.vmem [shape: f32[2,16,256], index: 3, kind: output, shape index: {}]  }
   0x1 LB: > { %s1149_s13 = sadd.s32 4294967295, %s1338_s12   ;;  %p1153_p0 = scmp.ge.s32.totalorder %s1338_s12, 1  ;;  %s1338_s12 = sphi %s1361_s12, %s13_s12  }
   0x2   : > { %p137_p1 = scmp.lt.s32.totalorder %s1338_s12, 3 }
   0x4   : > { %p138_p2 = pnand %p1153_p0, %p137_p1 }
   0x6   : > { %141 = sbr.rel (%p138_p2) target bundleno = 1142 (0x476), region = 32 }
   0xd   : > { %p161_p3 = scmp.lt.s32.totalorder %s1149_s13, 1  ;;  %v1340_v0 = vmov 0   ;;  %v183_v1 = vld [vmem:[%s2350_s2 + $0x8] sm:$0xff]  ;;  %v182_v2 = vld [vmem:[%s2350_s2] sm:$0xff]  ;;  %v184_v9 = vld [vmem:[%s2350_s2 + $0x10] sm:$0xff]  ;;  %vm216_vm0 = vcmask 130048  }
   0xe   : > { %255 = vmatprep.mubr.bf16.mxu0 %v1340_v0  ;;  %1193 = vset.pattern.permute.xlu0 %v1340_v0  ;;  %v1194_v10 = vld [vmem:[%s2349_s1] sm:$0xff]   ;;  %v185_v11 = vld [vmem:[%s2350_s2 + $0x18] sm:$0xff]  ;;  %v1195_v12 = vld [vmem:[%s2349_s1 + $0x8] sm:$0xff]   ;;  %vm407_vm1 = vcmask 1043456   ;;  %vm358_vm2 = vcmask 64512  }
   0xf   : > { %s2554_s13 = smov (!%p161_p3, %s1149_s13), 1  ;;  %446 = vmatprep.mubr.bf16.mxu1 %v1340_v0  ;;  %193 = vperm.xlu0 %1193, %v183_v1  }
  0x10   : > { %s1181_s16 = sshll.u32 %s2554_s13, 5 }
  0x11   : > { %s1386_s21 = scalar_lea.vmem %s2348_s0, %s1181_s16  ;;  %s170_s5 = scalar_lea.vmem %s2351_s3, %s1181_s16 }
  0x12   : > { %v173_v3 = vld [vmem:[%s1386_s21 + $0x8] sm:$0xff]  ;;  %v175_v4 = vld [vmem:[%s1386_s21 + $0x18] sm:$0xff]  ;;  %v172_v5 = vld [vmem:[%s1386_s21] sm:$0xff] }
  0x13   : > { %v181_v6 = vpack.c.bf16 %v175_v4, %v173_v3  ;;  %v174_v7 = vld [vmem:[%s1386_s21 + $0x10] sm:$0xff]  ;;  %188 = vperm.xlu0 %1193, %v182_v2  }
  0x14   : > { %v180_v8 = vpack.c.bf16 %v174_v7, %v172_v5 }
  0x15   : > { %223 = vmatprep.subr.bf16.mxu0 %v181_v6 }
  0x16   : > { %224 = vmatpush1.bf16.msra.mxu0 %v180_v8 }
  0x17   : > { %198 = vperm.xlu0 %1193, %v184_v9  }
  0x19   : > { %1160 = vmatmul.mubr.msk.bf16.vlgmr.msra.gmra.mrb[0].mxu0 %vm216_vm0, %v1194_v10 }
  0x1a   : > { %265 = vmatprep.mubr.bf16.mxu0 %v1340_v0 }
  0x1b   : > { %203 = vperm.xlu0 %1193, %v185_v11  }
  0x21   : > { %1161 = vmatmul.mubr.msk.bf16.gmra.mrb[4].mxu0 %vm216_vm0, %v1195_v12 }
  0x8e   : > { %v194_v13 = vpop.permute.xlu0 %193 }
  0x92   : > { %v189_v14 = vpop.permute.xlu0 %188 }
  0x96   : > { %v199_v23 = vpop.permute.xlu0 %198 }
  0x9a   : > { %v204_v29 = vpop.permute.xlu0 %203 }
  0xec   : > { %v257_v15 = vpop.f32.mrb[0].mxu0 }
  0xed   : > { %v258_v16 = vadd.f32 %v257_v15, %v189_v14  ;;  %v259_v17 = vpop.f32.mrb[1].mxu0 }
  0xee   : > { %v260_v18 = vadd.f32 %v259_v17, %v189_v14  ;;  %v261_v19 = vpop.f32.mrb[2].mxu0 }
  0xef   : > { %v356_v20 = vpack.c.bf16 %v258_v16, %v258_v16  ;;  %v263_v21 = vpop.f32.mrb[3].mxu0  ;;  %v262_v22 = vadd.f32 %v261_v19, %v194_v13 }
  0xf0   : > { %v357_v24 = vpack.c.bf16 %v260_v18, %v260_v18  ;;  %v264_v25 = vadd.f32 %v263_v21, %v194_v13 }
  0xf1   : > { %276 = vxpose.xlu1.b32.start.end [1/1] (short) %v262_v22, 128  ;;  %v409_v26 = vsel %vm407_vm1, %v356_v20, 0 }
  0xf2   : > { %1162 = vmatprep.subr.msk.bf16.mxu1 %vm407_vm1, %v357_v24 }
  0xf3   : > { %415 = vmatpush1.bf16.msra.mxu1 %v409_v26 }
  0xf4   : > { %v267_v27 = vpop.f32.mrb[4].mxu0 }
  0xf5   : > { %v269_v28 = vpop.f32.mrb[5].mxu0  ;;  %v1405_v31 = vadd.f32 %v267_v27, %v199_v23 }
  0xf6   : > { %v271_v30 = vpop.f32.mrb[6].mxu0  ;;  %v270_v34 = vadd.f32 %v269_v28, %v199_v23 }
  0xf7   : > { %2411 = vst [vmem:[#allocation2_spill] sm:$0xff] %v1405_v31  ;;  %v1407_v32 = vadd.f32 %v271_v30, %v204_v29  ;;  %v273_v33 = vpop.f32.mrb[7].mxu0 }
  0xf8   : > { %v274_v35 = vadd.f32 %v273_v33, %v204_v29 }
  0xf9   : > { %2412 = vst [vmem:[#allocation3_spill] sm:$0xff] %v1407_v32 }
  0xfa   : > { %v1014_v37 = vpack.c.bf16 %v274_v35, %v270_v34 }
  0xfc   : > { %1079 = vmatprep.mubr.bf16.mxu0 %v1014_v37 }
 0x12e   : > { %308 = vxpose.xlu1.b32.start.end [1/1] (short) %v264_v25, 128 }
 0x171   : > { %v292_v38 = vpop.trf.xlu1 }
 0x175   : > { %v293_v39 = vpop.trf.xlu1 }
 0x176   : > { %v340_v40 = vpack.c.bf16 %v293_v39, %v292_v38 }
 0x178   : > { %1163 = vmatmul.mubr.msk.bf16.vlgmr.msra.gmra.mrb[0].mxu1 %vm358_vm2, %v340_v40 }
 0x179   : > { %v294_v41 = vpop.trf.xlu1  ;;  %456 = vmatprep.mubr.bf16.mxu1 %v1340_v0 }
 0x17d   : > { %v295_v42 = vpop.trf.xlu1 }
 0x17e   : > { %v341_v43 = vpack.c.bf16 %v295_v42, %v294_v41 }
 0x180   : > { %1164 = vmatmul.mubr.msk.bf16.gmra.mrb[4].mxu1 %vm358_vm2, %v341_v43 }
 0x181   : > { %v296_v44 = vpop.trf.xlu1  ;;  %466 = vmatprep.mubr.bf16.mxu1 %v1340_v0 }
 0x185   : > { %v297_v45 = vpop.trf.xlu1 }
 0x186   : > { %v342_v46 = vpack.c.bf16 %v297_v45, %v296_v44 }
 0x188   : > { %1165 = vmatmul.mubr.msk.bf16.gmra.mrb[8].mxu1 %vm358_vm2, %v342_v46 }
 0x189   : > { %v298_v47 = vpop.trf.xlu1  ;;  %476 = vmatprep.mubr.bf16.mxu1 %v1340_v0 }
 0x18d   : > { %v299_v48 = vpop.trf.xlu1 }
 0x18e   : > { %v343_v49 = vpack.c.bf16 %v299_v48, %v298_v47 }
 0x190   : > { %1166 = vmatmul.mubr.msk.bf16.gmra.mrb[12].mxu1 %vm358_vm2, %v343_v49 }
 0x191   : > { %v300_v50 = vpop.trf.xlu1  ;;  %486 = vmatprep.mubr.bf16.mxu1 %v1340_v0 }
 0x195   : > { %v301_v51 = vpop.trf.xlu1 }
 0x196   : > { %v344_v52 = vpack.c.bf16 %v301_v51, %v300_v50 }
 0x198   : > { %1167 = vmatmul.mubr.msk.bf16.gmra.mrb[16].mxu1 %vm358_vm2, %v344_v52 }
 0x199   : > { %v302_v53 = vpop.trf.xlu1  ;;  %496 = vmatprep.mubr.bf16.mxu1 %v1340_v0 }
 0x19d   : > { %v303_v54 = vpop.trf.xlu1 }
 0x19e   : > { %v345_v55 = vpack.c.bf16 %v303_v54, %v302_v53 }
 0x1a0   : > { %1168 = vmatmul.mubr.msk.bf16.gmra.mrb[20].mxu1 %vm358_vm2, %v345_v55 }
 0x1a1   : > { %v304_v56 = vpop.trf.xlu1  ;;  %506 = vmatprep.mubr.bf16.mxu1 %v1340_v0 }
 0x1a5   : > { %v305_v57 = vpop.trf.xlu1 }
 0x1a6   : > { %v346_v58 = vpack.c.bf16 %v305_v57, %v304_v56 }
 0x1a8   : > { %1169 = vmatmul.mubr.msk.bf16.gmra.mrb[24].mxu1 %vm358_vm2, %v346_v58 }
 0x1a9   : > { %v306_v59 = vpop.trf.xlu1  ;;  %516 = vmatprep.mubr.bf16.mxu1 %v1340_v0 }
 0x1ad   : > { %v307_v60 = vpop.trf.xlu1 }
 0x1ae   : > { %v347_v61 = vpack.c.bf16 %v307_v60, %v306_v59 }
 0x1b0   : > { %1170 = vmatmul.mubr.msk.bf16.gmra.mrb[28].mxu1 %vm358_vm2, %v347_v61 }
 0x1b1   : > { %v324_v62 = vpop.trf.xlu1  ;;  %526 = vmatprep.mubr.bf16.mxu1 %v1340_v0 }
 0x1b5   : > { %v325_v63 = vpop.trf.xlu1 }
 0x1b6   : > { %v348_v1 = vpack.c.bf16 %v325_v63, %v324_v62 }
 0x1b8   : > { %1171 = vmatmul.mubr.msk.bf16.gmra.mrb[32].mxu1 %vm358_vm2, %v348_v1 }
 0x1b9   : > { %v326_v2 = vpop.trf.xlu1  ;;  %536 = vmatprep.mubr.bf16.mxu1 %v1340_v0 }
 0x1bd   : > { %v327_v3 = vpop.trf.xlu1 }
 0x1be   : > { %v349_v4 = vpack.c.bf16 %v327_v3, %v326_v2 }
 0x1c0   : > { %1172 = vmatmul.mubr.msk.bf16.gmra.mrb[36].mxu1 %vm358_vm2, %v349_v4 }
 0x1c1   : > { %v328_v5 = vpop.trf.xlu1  ;;  %546 = vmatprep.mubr.bf16.mxu1 %v1340_v0 }
 0x1c5   : > { %v329_v6 = vpop.trf.xlu1 }
 0x1c6   : > { %v350_v7 = vpack.c.bf16 %v329_v6, %v328_v5 }
 0x1c8   : > { %1173 = vmatmul.mubr.msk.bf16.gmra.mrb[40].mxu1 %vm358_vm2, %v350_v7 }
 0x1c9   : > { %v330_v8 = vpop.trf.xlu1  ;;  %556 = vmatprep.mubr.bf16.mxu1 %v1340_v0 }
 0x1cd   : > { %v331_v9 = vpop.trf.xlu1 }
 0x1ce   : > { %v351_v10 = vpack.c.bf16 %v331_v9, %v330_v8 }
 0x1d0   : > { %1174 = vmatmul.mubr.msk.bf16.gmra.mrb[44].mxu1 %vm358_vm2, %v351_v10 }
 0x1d1   : > { %v332_v11 = vpop.trf.xlu1  ;;  %566 = vmatprep.mubr.bf16.mxu1 %v1340_v0 }
 0x1d5   : > { %v333_v12 = vpop.trf.xlu1 }
 0x1d6   : > { %v352_v13 = vpack.c.bf16 %v333_v12, %v332_v11 }
 0x1d8   : > { %1175 = vmatmul.mubr.msk.bf16.gmra.mrb[48].mxu1 %vm358_vm2, %v352_v13 }
 0x1d9   : > { %v334_v14 = vpop.trf.xlu1  ;;  %576 = vmatprep.mubr.bf16.mxu1 %v1340_v0 }
 0x1dd   : > { %v335_v15 = vpop.trf.xlu1 }
 0x1de   : > { %v353_v16 = vpack.c.bf16 %v335_v15, %v334_v14 }
 0x1e0   : > { %1176 = vmatmul.mubr.msk.bf16.gmra.mrb[52].mxu1 %vm358_vm2, %v353_v16 }
 0x1e1   : > { %v336_v17 = vpop.trf.xlu1  ;;  %586 = vmatprep.mubr.bf16.mxu1 %v1340_v0 }
 0x1e5   : > { %v337_v18 = vpop.trf.xlu1 }
 0x1e6   : > { %v354_v19 = vpack.c.bf16 %v337_v18, %v336_v17 }
 0x1e8   : > { %1177 = vmatmul.mubr.msk.bf16.gmra.mrb[56].mxu1 %vm358_vm2, %v354_v19 }
 0x1e9   : > { %v338_v20 = vpop.trf.xlu1  ;;  %596 = vmatprep.mubr.bf16.mxu1 %v1340_v0 }
 0x1ed   : > { %v339_v21 = vpop.trf.xlu1 }
 0x1ee   : > { %v355_v22 = vpack.c.bf16 %v339_v21, %v338_v20 }
 0x1f0   : > { %1178 = vmatmul.mubr.msk.bf16.gmra.mrb[60].mxu1 %vm358_vm2, %v355_v22 }
 0x24b   : > { %v1442_v23 = vpop.f32.mrb[0].mxu1 }
 0x24c   : > { %v1444_v24 = vpop.f32.mrb[1].mxu1 }
 0x24d   : > { %v1446_v25 = vpop.f32.mrb[2].mxu1 }
 0x24e   : > { %v1448_v26 = vpop.f32.mrb[3].mxu1 }
 0x253   : > { %v1450_v27 = vpop.f32.mrb[4].mxu1 }
 0x254   : > { %v607_v28 = vmax.f32 %v1442_v23, %v1450_v27  ;;  %v1454_v29 = vpop.f32.mrb[5].mxu1 }
 0x255   : > { %v644_v0 = vmax.f32 %v1444_v24, %v1454_v29  ;;  %v1458_v30 = vpop.f32.mrb[6].mxu1 }
 0x256   : > { %v608_v33 = vmax.f32 %v1446_v25, %v1458_v30  ;;  %v1462_v34 = vpop.f32.mrb[7].mxu1 }
 0x257   : > { %v645_v35 = vmax.f32 %v1448_v26, %v1462_v34 }
 0x25b   : > { %v1466_v37 = vpop.f32.mrb[8].mxu1 }
 0x25c   : > { %v609_v38 = vmax.f32 %v607_v28, %v1466_v37  ;;  %v1469_v39 = vpop.f32.mrb[9].mxu1 }
 0x25d   : > { %v646_v40 = vmax.f32 %v644_v0, %v1469_v39  ;;  %v1472_v41 = vpop.f32.mrb[10].mxu1 }
 0x25e   : > { %v610_v42 = vmax.f32 %v608_v33, %v1472_v41  ;;  %v1475_v43 = vpop.f32.mrb[11].mxu1 }
 0x25f   : > { %v647_v44 = vmax.f32 %v645_v35, %v1475_v43 }
 0x263   : > { %v1478_v45 = vpop.f32.mrb[12].mxu1 }
 0x264   : > { %v611_v46 = vmax.f32 %v609_v38, %v1478_v45  ;;  %v1481_v47 = vpop.f32.mrb[13].mxu1 }
 0x265   : > { %v648_v48 = vmax.f32 %v646_v40, %v1481_v47  ;;  %v1484_v49 = vpop.f32.mrb[14].mxu1 }
 0x266   : > { %v612_v50 = vmax.f32 %v610_v42, %v1484_v49  ;;  %v1487_v51 = vpop.f32.mrb[15].mxu1 }
 0x267   : > { %v649_v52 = vmax.f32 %v647_v44, %v1487_v51 }
 0x26b   : > { %v1490_v53 = vpop.f32.mrb[16].mxu1 }
 0x26c   : > { %v613_v54 = vmax.f32 %v611_v46, %v1490_v53  ;;  %v1493_v55 = vpop.f32.mrb[17].mxu1 }
 0x26d   : > { %v650_v56 = vmax.f32 %v648_v48, %v1493_v55  ;;  %v1496_v57 = vpop.f32.mrb[18].mxu1 }
 0x26e   : > { %v614_v58 = vmax.f32 %v612_v50, %v1496_v57  ;;  %v1499_v59 = vpop.f32.mrb[19].mxu1 }
 0x26f   : > { %v651_v60 = vmax.f32 %v649_v52, %v1499_v59 }
 0x273   : > { %v1502_v61 = vpop.f32.mrb[20].mxu1 }
 0x274   : > { %v615_v62 = vmax.f32 %v613_v54, %v1502_v61  ;;  %v1505_v63 = vpop.f32.mrb[21].mxu1 }
 0x275   : > { %v652_v1 = vmax.f32 %v650_v56, %v1505_v63  ;;  %v1508_v2 = vpop.f32.mrb[22].mxu1 }
 0x276   : > { %v616_v3 = vmax.f32 %v614_v58, %v1508_v2  ;;  %v1511_v4 = vpop.f32.mrb[23].mxu1 }
 0x277   : > { %2413 = vst [vmem:[#allocation4_spill] sm:$0xff] %v1511_v4  ;;  %v653_v5 = vmax.f32 %v651_v60, %v1511_v4 }
 0x27b   : > { %v1514_v6 = vpop.f32.mrb[24].mxu1 }
 0x27c   : > { %v617_v7 = vmax.f32 %v615_v62, %v1514_v6  ;;  %v1517_v8 = vpop.f32.mrb[25].mxu1 }
 0x27d   : > { %2414 = vst [vmem:[#allocation5_spill] sm:$0xff] %v1517_v8  ;;  %v654_v9 = vmax.f32 %v652_v1, %v1517_v8  ;;  %v1520_v10 = vpop.f32.mrb[26].mxu1 }
 0x27e   : > { %v618_v11 = vmax.f32 %v616_v3, %v1520_v10  ;;  %v1523_v12 = vpop.f32.mrb[27].mxu1 }
 0x27f   : > { %2415 = vst [vmem:[#allocation6_spill] sm:$0xff] %v1523_v12  ;;  %v655_v13 = vmax.f32 %v653_v5, %v1523_v12 }
 0x283   : > { %v1526_v14 = vpop.f32.mrb[28].mxu1 }
 0x284   : > { %v619_v15 = vmax.f32 %v617_v7, %v1526_v14  ;;  %v1529_v16 = vpop.f32.mrb[29].mxu1 }
 0x285   : > { %2416 = vst [vmem:[#allocation7_spill] sm:$0xff] %v1529_v16  ;;  %v656_v17 = vmax.f32 %v654_v9, %v1529_v16  ;;  %v1532_v18 = vpop.f32.mrb[30].mxu1 }
 0x286   : > { %v620_v19 = vmax.f32 %v618_v11, %v1532_v18  ;;  %v1535_v20 = vpop.f32.mrb[31].mxu1 }
 0x287   : > { %2417 = vst [vmem:[#allocation8_spill] sm:$0xff] %v1535_v20  ;;  %v657_v21 = vmax.f32 %v655_v13, %v1535_v20 }
 0x28b   : > { %v1538_v22 = vpop.f32.mrb[32].mxu1 }
 0x28c   : > { %v621_v28 = vmax.f32 %v619_v15, %v1538_v22  ;;  %v1541_v0 = vpop.f32.mrb[33].mxu1 }
 0x28d   : > { %2418 = vst [vmem:[#allocation9_spill] sm:$0xff] %v1541_v0  ;;  %v658_v33 = vmax.f32 %v656_v17, %v1541_v0  ;;  %v1544_v35 = vpop.f32.mrb[34].mxu1 }
 0x28e   : > { %v622_v38 = vmax.f32 %v620_v19, %v1544_v35  ;;  %v1547_v40 = vpop.f32.mrb[35].mxu1 }
 0x28f   : > { %2419 = vst [vmem:[#allocation10_spill] sm:$0xff] %v1547_v40  ;;  %v659_v42 = vmax.f32 %v657_v21, %v1547_v40 }
 0x293   : > { %v1550_v44 = vpop.f32.mrb[36].mxu1 }
 0x294   : > { %v623_v46 = vmax.f32 %v621_v28, %v1550_v44  ;;  %v1553_v48 = vpop.f32.mrb[37].mxu1 }
 0x295   : > { %2420 = vst [vmem:[#allocation11_spill] sm:$0xff] %v1553_v48  ;;  %v660_v50 = vmax.f32 %v658_v33, %v1553_v48  ;;  %v1556_v52 = vpop.f32.mrb[38].mxu1 }
 0x296   : > { %v624_v54 = vmax.f32 %v622_v38, %v1556_v52  ;;  %v1559_v56 = vpop.f32.mrb[39].mxu1 }
 0x297   : > { %2421 = vst [vmem:[#allocation12_spill] sm:$0xff] %v1559_v56  ;;  %v661_v58 = vmax.f32 %v659_v42, %v1559_v56 }
 0x29b   : > { %v1562_v60 = vpop.f32.mrb[40].mxu1 }
 0x29c   : > { %v625_v62 = vmax.f32 %v623_v46, %v1562_v60  ;;  %v1565_v1 = vpop.f32.mrb[41].mxu1 }
 0x29d   : > { %2422 = vst [vmem:[#allocation13_spill] sm:$0xff] %v1565_v1  ;;  %v662_v3 = vmax.f32 %v660_v50, %v1565_v1  ;;  %v1568_v5 = vpop.f32.mrb[42].mxu1 }
 0x29e   : > { %v626_v7 = vmax.f32 %v624_v54, %v1568_v5  ;;  %v1571_v9 = vpop.f32.mrb[43].mxu1 }
 0x29f   : > { %2423 = vst [vmem:[#allocation14_spill] sm:$0xff] %v1571_v9  ;;  %v663_v11 = vmax.f32 %v661_v58, %v1571_v9 }
 0x2a3   : > { %v1574_v13 = vpop.f32.mrb[44].mxu1 }
 0x2a4   : > { %v627_v15 = vmax.f32 %v625_v62, %v1574_v13  ;;  %v1577_v17 = vpop.f32.mrb[45].mxu1 }
 0x2a5   : > { %2424 = vst [vmem:[#allocation15_spill] sm:$0xff] %v1577_v17  ;;  %v664_v19 = vmax.f32 %v662_v3, %v1577_v17  ;;  %v1580_v21 = vpop.f32.mrb[46].mxu1 }
 0x2a6   : > { %v628_v28 = vmax.f32 %v626_v7, %v1580_v21  ;;  %v1583_v33 = vpop.f32.mrb[47].mxu1 }
 0x2a7   : > { %2425 = vst [vmem:[#allocation16_spill] sm:$0xff] %v1583_v33  ;;  %v665_v38 = vmax.f32 %v663_v11, %v1583_v33 }
 0x2ab   : > { %v1586_v42 = vpop.f32.mrb[48].mxu1 }
 0x2ac   : > { %v629_v46 = vmax.f32 %v627_v15, %v1586_v42  ;;  %v1589_v50 = vpop.f32.mrb[49].mxu1 }
 0x2ad   : > { %2426 = vst [vmem:[#allocation17_spill] sm:$0xff] %v1589_v50  ;;  %v666_v54 = vmax.f32 %v664_v19, %v1589_v50  ;;  %v1592_v58 = vpop.f32.mrb[50].mxu1 }
 0x2ae   : > { %v630_v62 = vmax.f32 %v628_v28, %v1592_v58  ;;  %v1595_v3 = vpop.f32.mrb[51].mxu1 }
 0x2af   : > { %2427 = vst [vmem:[#allocation18_spill] sm:$0xff] %v1595_v3  ;;  %v667_v7 = vmax.f32 %v665_v38, %v1595_v3 }
 0x2b3   : > { %v1598_v36 = vpop.f32.mrb[52].mxu1 }
 0x2b4   : > { %v631_v11 = vmax.f32 %v629_v46, %v1598_v36  ;;  %v1601_v31 = vpop.f32.mrb[53].mxu1 }
 0x2b5   : > { %2428 = vst [vmem:[#allocation19_spill] sm:$0xff] %v1601_v31  ;;  %v668_v15 = vmax.f32 %v666_v54, %v1601_v31  ;;  %v1604_v32 = vpop.f32.mrb[54].mxu1 }
 0x2b6   : > { %v632_v19 = vmax.f32 %v630_v62, %v1604_v32  ;;  %v1607_v50 = vpop.f32.mrb[55].mxu1 }
 0x2b7   : > { %2429 = vst [vmem:[#allocation20_spill] sm:$0xff] %v1607_v50  ;;  %v669_v28 = vmax.f32 %v667_v7, %v1607_v50 }
 0x2bb   : > { %v1610_v33 = vpop.f32.mrb[56].mxu1 }
 0x2bc   : > { %v633_v38 = vmax.f32 %v631_v11, %v1610_v33  ;;  %v1613_v3 = vpop.f32.mrb[57].mxu1 }
 0x2bd   : > { %2430 = vst [vmem:[#allocation21_spill] sm:$0xff] %v1613_v3  ;;  %v670_v46 = vmax.f32 %v668_v15, %v1613_v3  ;;  %v1616_v17 = vpop.f32.mrb[58].mxu1 }
 0x2be   : > { %v634_v54 = vmax.f32 %v632_v19, %v1616_v17  ;;  %v1619_v31 = vpop.f32.mrb[59].mxu1 }
 0x2bf   : > { %2431 = vst [vmem:[#allocation22_spill] sm:$0xff] %v1619_v31  ;;  %v671_v62 = vmax.f32 %v669_v28, %v1619_v31 }
 0x2c3   : > { %v1622_v9 = vpop.f32.mrb[60].mxu1 }
 0x2c4   : > { %v635_v7 = vmax.f32 %v633_v38, %v1622_v9  ;;  %v1625_v50 = vpop.f32.mrb[61].mxu1 }
 0x2c5   : > { %2432 = vst [vmem:[#allocation23_spill] sm:$0xff] %v1625_v50  ;;  %v672_v11 = vmax.f32 %v670_v46, %v1625_v50  ;;  %v1628_v1 = vpop.f32.mrb[62].mxu1 }
 0x2c6   : > { %v636_v15 = vmax.f32 %v634_v54, %v1628_v1  ;;  %v1631_v3 = vpop.f32.mrb[63].mxu1 }
 0x2c7   : > { %2433 = vst [vmem:[#allocation24_spill] sm:$0xff] %v1631_v3  ;;  %v673_v19 = vmax.f32 %v671_v62, %v1631_v3 }
 0x2c8   : > { %v637_v56 = vmax.f32 %v635_v7, %v636_v15 }
 0x2c9   : > { %v674_v48 = vmax.f32 %v672_v11, %v673_v19 }
 0x2ca   : > { %v638_v40 = vrot.slane %v637_v56, 4 }
 0x2cb   : > { %v675_v28 = vrot.slane %v674_v48, 4 }
 0x2cc   : > { %v639_v31 = vmax.f32 %v637_v56, %v638_v40 }
 0x2cd   : > { %v676_v0 = vmax.f32 %v674_v48, %v675_v28 }
 0x2ce   : > { %v640_v20 = vrot.slane %v639_v31, 2 }
 0x2cf   : > { %v677_v38 = vrot.slane %v676_v0, 2 }
 0x2d0   : > { %v641_v16 = vmax.f32 %v639_v31, %v640_v20 }
 0x2d1   : > { %v678_v12 = vmax.f32 %v676_v0, %v677_v38 }
 0x2d2   : > { %v642_v8 = vrot.slane %v641_v16, 1 }
 0x2d3   : > { %v679_v46 = vrot.slane %v678_v12, 1 }
 0x2d4   : > { %v1634_v50 = vmax.f32 %v641_v16, %v642_v8 }
 0x2d5   : > { %v1636_v4 = vmax.f32 %v678_v12, %v679_v46 }
 0x2d6   : > { %v681_v54 = vsub.f32 %v1442_v23, %v1634_v50  ;;  %v683_v62 = vsub.f32 %v1446_v25, %v1634_v50  ;;  %v685_v40 = vsub.f32 %v1450_v27, %v1634_v50  ;;  %v687_v48 = vsub.f32 %v1458_v30, %v1634_v50 }
 0x2d7   : > { %v689_v31 = vsub.f32 %v1466_v37, %v1634_v50  ;;  %v691_v8 = vsub.f32 %v1472_v41, %v1634_v50  ;;  %v693_v12 = vsub.f32 %v1478_v45, %v1634_v50  ;;  %v695_v23 = vsub.f32 %v1484_v49, %v1634_v50  ;;  %v2456_v45 = vld [vmem:[#allocation20_spill] sm:$0xff] }
 0x2d8   : > { %v697_v25 = vsub.f32 %v1490_v53, %v1634_v50  ;;  %v699_v27 = vsub.f32 %v1496_v57, %v1634_v50  ;;  %v701_v30 = vsub.f32 %v1502_v61, %v1634_v50  ;;  %v703_v37 = vsub.f32 %v1508_v2, %v1634_v50  ;;  %v2449_v61 = vld [vmem:[#allocation15_spill] sm:$0xff]  ;;  %v2452_v53 = vld [vmem:[#allocation17_spill] sm:$0xff] }
 0x2d9   : > { %v745_v56 = vmul.f32 1.442695, %v681_v54  ;;  %v749_v19 = vmul.f32 1.442695, %v683_v62  ;;  %v753_v0 = vmul.f32 1.442695, %v685_v40  ;;  %v2461_v2 = vsub.f32 %v1526_v14, %v1634_v50 }
 0x2da   : > { %v757_v46 = vmul.f32 1.442695, %v687_v48  ;;  %v761_v7 = vmul.f32 1.442695, %v689_v31  ;;  %v765_v20 = vmul.f32 1.442695, %v691_v8  ;;  %v2464_v14 = vsub.f32 %v1544_v35, %v1634_v50 }
 0x2db   : > { %1196 = vpow2.f32 %v745_v56  ;;  %v769_v11 = vmul.f32 1.442695, %v693_v12  ;;  %v773_v16 = vmul.f32 1.442695, %v695_v23  ;;  %v777_v31 = vmul.f32 1.442695, %v697_v25 }
 0x2dc   : > { %1198 = vpow2.f32 %v749_v19  ;;  %v2436_v25 = vld [vmem:[#allocation4_spill] sm:$0xff]  ;;  %v2437_v12 = vld [vmem:[#allocation5_spill] sm:$0xff]  ;;  %v2438_v23 = vld [vmem:[#allocation6_spill] sm:$0xff]  ;;  %v785_v54 = vmul.f32 1.442695, %v701_v30 }
 0x2dd   : > { %1200 = vpow2.f32 %v753_v0  ;;  %v2440_v56 = vld [vmem:[#allocation7_spill] sm:$0xff]  ;;  %v2443_v8 = vld [vmem:[#allocation10_spill] sm:$0xff]  ;;  %v2447_v62 = vld [vmem:[#allocation13_spill] sm:$0xff]  ;;  %v801_v40 = vmul.f32 1.442695, %v2461_v2 }
 0x2de   : > { %1202 = vpow2.f32 %v757_v46  ;;  %v781_v46 = vmul.f32 1.442695, %v699_v27  ;;  %v2442_v27 = vld [vmem:[#allocation9_spill] sm:$0xff]  ;;  %v2444_v48 = vld [vmem:[#allocation11_spill] sm:$0xff]  ;;  %v2448_v19 = vld [vmem:[#allocation14_spill] sm:$0xff] }
 0x2df   : > { %1204 = vpow2.f32 %v761_v7  ;;  %v2441_v7 = vld [vmem:[#allocation8_spill] sm:$0xff]  ;;  %v2453_v30 = vld [vmem:[#allocation18_spill] sm:$0xff]  ;;  %v813_v2 = vmul.f32 1.442695, %v2464_v14 }
 0x2e0   : > { %1206 = vpow2.f32 %v765_v20 }
 0x2e1   : > { %1208 = vpow2.f32 %v769_v11 }
 0x2e2   : > { %1210 = vpow2.f32 %v773_v16  ;;  %v2446_v16 = vld [vmem:[#allocation12_spill] sm:$0xff] }
 0x2e3   : > { %1212 = vpow2.f32 %v777_v31 }
 0x2e4   : > { %1214 = vpow2.f32 %v781_v46  ;;  %v2457_v46 = vld [vmem:[#allocation21_spill] sm:$0xff] }
 0x2e5   : > { %v1714_v0 = vpop.eup %1196  ;;  %1216 = vpow2.f32 %v785_v54 }
 0x2e6   : > { %2434 = vst [vmem:[#allocation25_spill] sm:$0xff] %v1714_v0  ;;  %v1722_v20 = vpop.eup %1198 }
 0x2e7   : > { %2435 = vst [vmem:[#allocation26_spill] sm:$0xff] %v1722_v20  ;;  %v873_v15 = vadd.f32 %v1722_v20, %v1714_v0  ;;  %v1736_v11 = vpop.eup %1200  ;;  %v2460_v0 = vsub.f32 %v1520_v10, %v1634_v50  ;;  %v2463_v10 = vsub.f32 %v1538_v22, %v1634_v50  ;;  %v2466_v22 = vsub.f32 %v1448_v26, %v1636_v4 }
 0x2e8   : > { %2439 = vst [vmem:[#allocation4_spill] sm:$0xff] %v1736_v11  ;;  %v1749_v57 = vpop.eup %1202 }
 0x2e9   : > { %v874_v38 = vadd.f32 %v1736_v11, %v873_v15  ;;  %2445 = vst [vmem:[#allocation5_spill] sm:$0xff] %v1749_v57  ;;  %v789_v15 = vmul.f32 1.442695, %v703_v37  ;;  %v1765_v41 = vpop.eup %1204  ;;  %v2458_v11 = vld [vmem:[#allocation22_spill] sm:$0xff]  ;;  %v2459_v37 = vld [vmem:[#allocation23_spill] sm:$0xff] }
 0x2ea   : > { %2451 = vst [vmem:[#allocation6_spill] sm:$0xff] %v1765_v41  ;;  %v1781_v31 = vpop.eup %1206  ;;  %v797_v20 = vmul.f32 1.442695, %v2460_v0  ;;  %v809_v0 = vmul.f32 1.442695, %v2463_v10 }
 0x2eb   : > { %v875_v28 = vadd.f32 %v1749_v57, %v874_v38  ;;  %v2455_v38 = vsub.f32 %v1514_v6, %v1634_v50  ;;  %1218 = vpow2.f32 %v789_v15 }
 0x2ed   : > { %v793_v57 = vmul.f32 1.442695, %v2455_v38  ;;  %v876_v49 = vadd.f32 %v1765_v41, %v875_v28  ;;  %v1790_v38 = vpop.eup %1208 }
 0x2ee   : > { %v1796_v41 = vpop.eup %1210 }
 0x2ef   : > { %v877_v28 = vadd.f32 %v1781_v31, %v876_v49  ;;  %1220 = vpow2.f32 %v793_v57  ;;  %v1802_v3 = vpop.eup %1212  ;;  %v2462_v49 = vsub.f32 %v1532_v18, %v1634_v50 }
 0x2f0   : > { %1222 = vpow2.f32 %v797_v20  ;;  %v1811_v57 = vpop.eup %1214  ;;  %v2465_v20 = vsub.f32 %v1444_v24, %v1636_v4  ;;  %v2468_v24 = vsub.f32 %v1454_v29, %v1636_v4 }
 0x2f1   : > { %v878_v54 = vadd.f32 %v1790_v38, %v877_v28  ;;  %v805_v15 = vmul.f32 1.442695, %v2462_v49  ;;  %1224 = vpow2.f32 %v801_v40  ;;  %v1820_v49 = vpop.eup %1216  ;;  %v2467_v40 = vsub.f32 %v1550_v44, %v1634_v50 }
 0x2f2   : > { %v747_v18 = vmul.f32 1.442695, %v2465_v20  ;;  %v2471_v44 = vsub.f32 %v1462_v34, %v1636_v4 }
 0x2f3   : > { %v879_v6 = vadd.f32 %v1796_v41, %v878_v54  ;;  %1226 = vpow2.f32 %v805_v15  ;;  %v817_v10 = vmul.f32 1.442695, %v2467_v40  ;;  %v2469_v15 = vsub.f32 %v1556_v52, %v1634_v50 }
 0x2f4   : > { %1228 = vpow2.f32 %v809_v0  ;;  %v2474_v52 = vsub.f32 %v1469_v39, %v1636_v4 }
 0x2f5   : > { %v880_v28 = vadd.f32 %v1802_v3, %v879_v6  ;;  %v751_v6 = vmul.f32 1.442695, %v2466_v22  ;;  %v1829_v14 = vpop.eup %1218  ;;  %1230 = vpow2.f32 %v813_v2  ;;  %v821_v20 = vmul.f32 1.442695, %v2469_v15 }
 0x2f6   : > { %1232 = vpow2.f32 %v747_v18  ;;  %v2472_v2 = vsub.f32 %v1562_v60, %v1634_v50  ;;  %v763_v18 = vmul.f32 1.442695, %v2474_v52  ;;  %v2476_v60 = vsub.f32 %v1475_v43, %v1636_v4 }
 0x2f7   : > { %v881_v54 = vadd.f32 %v1811_v57, %v880_v28  ;;  %v755_v28 = vmul.f32 1.442695, %v2468_v24  ;;  %1234 = vpow2.f32 %v751_v6  ;;  %v2475_v6 = vsub.f32 %v1568_v5, %v1634_v50 }
 0x2f8   : > { %1236 = vpow2.f32 %v817_v10  ;;  %v825_v29 = vmul.f32 1.442695, %v2472_v2  ;;  %v767_v24 = vmul.f32 1.442695, %v2476_v60  ;;  %v2478_v5 = vsub.f32 %v1481_v47, %v1636_v4 }
 0x2f9   : > { %v882_v35 = vadd.f32 %v1820_v49, %v881_v54  ;;  %v1838_v0 = vpop.eup %1220  ;;  %v759_v54 = vmul.f32 1.442695, %v2471_v44  ;;  %1238 = vpow2.f32 %v755_v28  ;;  %v829_v34 = vmul.f32 1.442695, %v2475_v6 }
 0x2fa   : > { %2470 = vst [vmem:[#allocation7_spill] sm:$0xff] %v1838_v0  ;;  %v1847_v40 = vpop.eup %1222  ;;  %1240 = vpow2.f32 %v821_v20  ;;  %v2477_v28 = vsub.f32 %v1574_v13, %v1634_v50  ;;  %v2479_v43 = vsub.f32 %v1580_v21, %v1634_v50  ;;  %v2481_v47 = vsub.f32 %v1586_v42, %v1634_v50 }
 0x2fb   : > { %v883_v26 = vadd.f32 %v1829_v14, %v882_v35  ;;  %2473 = vst [vmem:[#allocation8_spill] sm:$0xff] %v1847_v40  ;;  %v1856_v35 = vpop.eup %1224  ;;  %1242 = vpow2.f32 %v759_v54 }
 0x2fc   : > { %1244 = vpow2.f32 %v825_v29  ;;  %v833_v39 = vmul.f32 1.442695, %v2477_v28  ;;  %v837_v54 = vmul.f32 1.442695, %v2479_v43  ;;  %v2480_v29 = vsub.f32 %v1487_v51, %v1636_v4 }
 0x2fd   : > { %v884_v22 = vadd.f32 %v1838_v0, %v883_v26  ;;  %v1865_v20 = vpop.eup %1226  ;;  %1246 = vpow2.f32 %v763_v18  ;;  %v771_v26 = vmul.f32 1.442695, %v2478_v5  ;;  %v841_v18 = vmul.f32 1.442695, %v2481_v47 }
 0x2fe   : > { %v1870_v44 = vpop.eup %1228  ;;  %1248 = vpow2.f32 %v829_v34  ;;  %v2482_v34 = vsub.f32 %v1493_v55, %v1636_v4  ;;  %v2483_v51 = vsub.f32 %v1592_v58, %v1634_v50  ;;  %v2487_v47 = vsub.f32 %v1604_v32, %v1634_v50 }
 0x2ff   : > { %v885_v10 = vadd.f32 %v1847_v40, %v884_v22  ;;  %v1876_v13 = vpop.eup %1230  ;;  %1250 = vpow2.f32 %v767_v24  ;;  %v775_v22 = vmul.f32 1.442695, %v2480_v29  ;;  %v2486_v29 = vsub.f32 %v1505_v63, %v1636_v4 }
 0x300   : > { %v1881_v52 = vpop.eup %1232  ;;  %1252 = vpow2.f32 %v833_v39  ;;  %v845_v24 = vmul.f32 1.442695, %v2483_v51 }
 0x301   : > { %v886_v15 = vadd.f32 %v1856_v35, %v885_v10  ;;  %v1887_v21 = vpop.eup %1234  ;;  %1254 = vpow2.f32 %v771_v26  ;;  %v779_v10 = vmul.f32 1.442695, %v2482_v34  ;;  %v2485_v26 = vsub.f32 %v1598_v36, %v1634_v50 }
 0x302   : > { %v1892_v60 = vpop.eup %1236  ;;  %1256 = vpow2.f32 %v837_v54  ;;  %v910_v42 = vadd.f32 %v1887_v21, %v1881_v52 }
 0x303   : > { %v887_v2 = vadd.f32 %v1865_v20, %v886_v15  ;;  %v1900_v39 = vpop.eup %1238  ;;  %1258 = vpow2.f32 %v775_v22  ;;  %v2484_v15 = vsub.f32 %v1499_v59, %v1636_v4  ;;  %v849_v58 = vmul.f32 1.442695, %v2485_v26 }
 0x304   : > { %v1905_v5 = vpop.eup %1240  ;;  %1260 = vpow2.f32 %v841_v18  ;;  %v911_v54 = vadd.f32 %v1900_v39, %v910_v42  ;;  %v787_v22 = vmul.f32 1.442695, %v2486_v29  ;;  %v853_v18 = vmul.f32 1.442695, %v2487_v47 }
 0x305   : > { %v888_v6 = vadd.f32 %v1870_v44, %v887_v2  ;;  %v783_v55 = vmul.f32 1.442695, %v2484_v15  ;;  %v1912_v2 = vpop.eup %1242  ;;  %1262 = vpow2.f32 %v779_v10  ;;  %v2488_v10 = vsub.f32 %v2436_v25, %v1636_v4 }
 0x306   : > { %v1917_v59 = vpop.eup %1244  ;;  %1264 = vpow2.f32 %v845_v24  ;;  %v2489_v24 = vsub.f32 %v1610_v33, %v1634_v50 }
 0x307   : > { %v889_v28 = vadd.f32 %v1876_v13, %v888_v6  ;;  %v912_v6 = vadd.f32 %v1912_v2, %v911_v54  ;;  %v1924_v34 = vpop.eup %1246  ;;  %1266 = vpow2.f32 %v783_v55  ;;  %v791_v51 = vmul.f32 1.442695, %v2488_v10 }
 0x308   : > { %v1929_v63 = vpop.eup %1248  ;;  %1268 = vpow2.f32 %v849_v58  ;;  %v2490_v55 = vsub.f32 %v2437_v12, %v1636_v4  ;;  %v2491_v58 = vsub.f32 %v1616_v17, %v1634_v50 }
 0x309   : > { %v890_v43 = vadd.f32 %v1892_v60, %v889_v28  ;;  %v857_v28 = vmul.f32 1.442695, %v2489_v24  ;;  %v913_v42 = vadd.f32 %v1924_v34, %v912_v6  ;;  %v1936_v15 = vpop.eup %1250  ;;  %1270 = vpow2.f32 %v787_v22 }
 0x30a   : > { %v795_v26 = vmul.f32 1.442695, %v2490_v55  ;;  %v1941_v25 = vpop.eup %1252  ;;  %1272 = vpow2.f32 %v853_v18  ;;  %v2492_v22 = vsub.f32 %v2438_v23, %v1636_v4  ;;  %v2493_v18 = vsub.f32 %v1622_v9, %v1634_v50 }
 0x30b   : > { %v891_v36 = vadd.f32 %v1905_v5, %v890_v43  ;;  %v861_v43 = vmul.f32 1.442695, %v2491_v58  ;;  %v914_v54 = vadd.f32 %v1936_v15, %v913_v42  ;;  %v1948_v29 = vpop.eup %1254  ;;  %1274 = vpow2.f32 %v791_v51 }
 0x30c   : > { %v799_v47 = vmul.f32 1.442695, %v2492_v22  ;;  %v1953_v12 = vpop.eup %1256  ;;  %1276 = vpow2.f32 %v857_v28  ;;  %v2494_v51 = vsub.f32 %v2440_v56, %v1636_v4  ;;  %v2495_v28 = vsub.f32 %v1628_v1, %v1634_v50 }
 0x30d   : > { %v892_v32 = vadd.f32 %v1917_v59, %v891_v36  ;;  %v865_v36 = vmul.f32 1.442695, %v2493_v18  ;;  %v915_v6 = vadd.f32 %v1948_v29, %v914_v54  ;;  %v1960_v10 = vpop.eup %1258  ;;  %1278 = vpow2.f32 %v795_v26 }
 0x30e   : > { %v803_v24 = vmul.f32 1.442695, %v2494_v51  ;;  %v1965_v23 = vpop.eup %1260  ;;  %1280 = vpow2.f32 %v861_v43  ;;  %v2496_v26 = vsub.f32 %v2441_v7, %v1636_v4  ;;  %v2497_v50 = vsub.f32 %v2442_v27, %v1636_v4 }
 0x30f   : > { %v893_v33 = vadd.f32 %v1929_v63, %v892_v32  ;;  %v869_v32 = vmul.f32 1.442695, %v2495_v28  ;;  %v916_v42 = vadd.f32 %v1960_v10, %v915_v6  ;;  %v1972_v55 = vpop.eup %1262  ;;  %1282 = vpow2.f32 %v799_v47 }
 0x310   : > { %v807_v58 = vmul.f32 1.442695, %v2496_v26  ;;  %v1977_v56 = vpop.eup %1264  ;;  %1284 = vpow2.f32 %v865_v36  ;;  %v811_v54 = vmul.f32 1.442695, %v2497_v50  ;;  %v2498_v36 = vsub.f32 %v2443_v8, %v1636_v4 }
 0x311   : > { %v894_v17 = vadd.f32 %v1941_v25, %v893_v33  ;;  %v917_v33 = vadd.f32 %v1972_v55, %v916_v42  ;;  %v1981_v1 = vpop.eup %1266  ;;  %1286 = vpow2.f32 %v803_v24  ;;  %v2499_v28 = vsub.f32 %v2444_v48, %v1636_v4 }
 0x312   : > { %v1986_v22 = vpop.eup %1268  ;;  %1288 = vpow2.f32 %v869_v32 }
 0x313   : > { %v895_v9 = vadd.f32 %v1953_v12, %v894_v17  ;;  %v918_v47 = vadd.f32 %v1981_v1, %v917_v33  ;;  %v1990_v18 = vpop.eup %1270  ;;  %1290 = vpow2.f32 %v807_v58  ;;  %v815_v17 = vmul.f32 1.442695, %v2498_v36 }
 0x314   : > { %v1995_v6 = vpop.eup %1272  ;;  %1292 = vpow2.f32 %v811_v54  ;;  %v819_v32 = vmul.f32 1.442695, %v2499_v28  ;;  %v2501_v58 = vsub.f32 %v2446_v16, %v1636_v4 }
 0x315   : > { %v896_v43 = vadd.f32 %v1965_v23, %v895_v9  ;;  %v919_v27 = vadd.f32 %v1990_v18, %v918_v47  ;;  %v1999_v24 = vpop.eup %1274  ;;  %1294 = vpow2.f32 %v815_v17 }
 0x316   : > { %v2004_v9 = vpop.eup %1276  ;;  %1296 = vpow2.f32 %v819_v32 }
 0x317   : > { %v897_v7 = vadd.f32 %v1977_v56, %v896_v43  ;;  %v920_v8 = vadd.f32 %v1999_v24, %v919_v27  ;;  %v2008_v26 = vpop.eup %1278  ;;  %v823_v43 = vmul.f32 1.442695, %v2501_v58  ;;  %v2504_v27 = vsub.f32 %v2448_v19, %v1636_v4  ;;  %v2506_v19 = vld [vmem:[#allocation16_spill] sm:$0xff] }
 0x318   : > { %2500 = vst [vmem:[#allocation9_spill] sm:$0xff] %v2008_v26  ;;  %v2013_v33 = vpop.eup %1280  ;;  %v2505_v58 = vsub.f32 %v2449_v61, %v1636_v4  ;;  %v2508_v61 = vsub.f32 %v2452_v53, %v1636_v4 }
 0x319   : > { %v898_v51 = vadd.f32 %v1986_v22, %v897_v7  ;;  %v921_v48 = vadd.f32 %v2008_v26, %v920_v8  ;;  %v2017_v54 = vpop.eup %1282  ;;  %v2503_v7 = vsub.f32 %v2447_v62, %v1636_v4  ;;  %1298 = vpow2.f32 %v823_v43 }
 0x31a   : > { %2502 = vst [vmem:[#allocation10_spill] sm:$0xff] %v2017_v54  ;;  %v2022_v36 = vpop.eup %1284  ;;  %v831_v28 = vmul.f32 1.442695, %v2504_v27  ;;  %v2507_v27 = vsub.f32 %v2506_v19, %v1636_v4 }
 0x31b   : > { %v899_v42 = vadd.f32 %v1995_v6, %v898_v51  ;;  %v827_v47 = vmul.f32 1.442695, %v2503_v7  ;;  %v922_v16 = vadd.f32 %v2017_v54, %v921_v48  ;;  %v2026_v51 = vpop.eup %1286 }
 0x31d   : > { %v900_v50 = vadd.f32 %v2004_v9, %v899_v42  ;;  %v2031_v42 = vpop.eup %1288  ;;  %v923_v62 = vadd.f32 %v2026_v51, %v922_v16  ;;  %1300 = vpow2.f32 %v827_v47  ;;  %v843_v47 = vmul.f32 1.442695, %v2508_v61 }
 0x31e   : > { %v2035_v8 = vpop.eup %1290  ;;  %1302 = vpow2.f32 %v831_v28  ;;  %v2509_v28 = vsub.f32 %v2453_v30, %v1636_v4  ;;  %v2512_v30 = vsub.f32 %v2456_v45, %v1636_v4 }
 0x31f   : > { %v901_v17 = vadd.f32 %v2013_v33, %v900_v50  ;;  %v835_v50 = vmul.f32 1.442695, %v2505_v58  ;;  %v924_v43 = vadd.f32 %v2035_v8, %v923_v62  ;;  %v2042_v7 = vpop.eup %1292 }
 0x320   : > { %v2048_v0 = vpop.eup %1294  ;;  %v847_v19 = vmul.f32 1.442695, %v2509_v28 }
 0x321   : > { %v902_v32 = vadd.f32 %v2022_v36, %v901_v17  ;;  %v839_v17 = vmul.f32 1.442695, %v2507_v27  ;;  %v925_v16 = vadd.f32 %v2042_v7, %v924_v43  ;;  %1304 = vpow2.f32 %v835_v50  ;;  %v2054_v58 = vpop.eup %1296  ;;  %v2510_v50 = vld [vmem:[#allocation19_spill] sm:$0xff] }
 0x322   : > { %v2511_v53 = vsub.f32 %v2510_v50, %v1636_v4 }
 0x323   : > { %v903_v48 = vadd.f32 %v2031_v42, %v902_v32  ;;  %v926_v62 = vadd.f32 %v2048_v0, %v925_v16  ;;  %1306 = vpow2.f32 %v839_v17  ;;  %v2060_v54 = vpop.eup %1298  ;;  %v855_v17 = vmul.f32 1.442695, %v2512_v30 }
 0x324   : > { %1308 = vpow2.f32 %v843_v47  ;;  %v851_v61 = vmul.f32 1.442695, %v2511_v53  ;;  %v2513_v47 = vsub.f32 %v2457_v46, %v1636_v4 }
 0x325   : > { %v904_v40 = vrot.slane %v903_v48, 4  ;;  %v927_v43 = vadd.f32 %v2054_v58, %v926_v62  ;;  %1310 = vpow2.f32 %v847_v19 }
 0x326   : > { %1312 = vpow2.f32 %v851_v61  ;;  %v859_v50 = vmul.f32 1.442695, %v2513_v47  ;;  %v2515_v61 = vsub.f32 %v2459_v37, %v1636_v4 }
 0x327   : > { %v905_v32 = vadd.f32 %v904_v40, %v903_v48  ;;  %v928_v48 = vadd.f32 %v2060_v54, %v927_v43  ;;  %v2066_v16 = vpop.eup %1300  ;;  %1314 = vpow2.f32 %v855_v17 }
 0x328   : > { %v2072_v26 = vpop.eup %1302  ;;  %1316 = vpow2.f32 %v859_v50  ;;  %v867_v46 = vmul.f32 1.442695, %v2515_v61 }
 0x329   : > { %v906_v27 = vrot.slane %v905_v32, 2  ;;  %v929_v62 = vadd.f32 %v2066_v16, %v928_v48 }
 0x32b   : > { %v907_v40 = vadd.f32 %v906_v27, %v905_v32  ;;  %v2514_v32 = vsub.f32 %v2458_v11, %v1636_v4  ;;  %v930_v19 = vadd.f32 %v2072_v26, %v929_v62  ;;  %v2081_v43 = vpop.eup %1304  ;;  %v2516_v62 = vld [vmem:[#allocation24_spill] sm:$0xff] }
 0x32c   : > { %v2517_v47 = vsub.f32 %v2516_v62, %v1636_v4 }
 0x32d   : > { %v908_v28 = vrot.slane %v907_v40, 1  ;;  %v863_v27 = vmul.f32 1.442695, %v2514_v32  ;;  %v931_v53 = vadd.f32 %v2081_v43, %v930_v19  ;;  %v2084_v48 = vpop.eup %1306 }
 0x32e   : > { %v2090_v11 = vpop.eup %1308 }
 0x32f   : > { %v909_v45 = vadd.f32 %v908_v28, %v907_v40  ;;  %1318 = vpow2.f32 %v863_v27  ;;  %v932_v30 = vadd.f32 %v2084_v48, %v931_v53  ;;  %v871_v40 = vmul.f32 1.442695, %v2517_v47  ;;  %v2096_v28 = vpop.eup %1310 }
 0x330   : > { %v2099_v32 = vpop.eup %1312 }
 0x331   : > { %1320 = vrcp.f32 %v909_v45  ;;  %v933_v17 = vadd.f32 %v2090_v11, %v932_v30  ;;  %v2102_v27 = vpop.eup %1314 }
 0x332   : > { %1322 = vpow2.f32 %v867_v46  ;;  %v2105_v45 = vpop.eup %1316 }
 0x333   : > { %v934_v50 = vadd.f32 %v2096_v28, %v933_v17  ;;  %1324 = vpow2.f32 %v871_v40 }
 0x335   : > { %v935_v37 = vadd.f32 %v2099_v32, %v934_v50 }
 0x337   : > { %v936_v19 = vadd.f32 %v2102_v27, %v935_v37 }
 0x339   : > { %v2107_v4 = vpop.eup %1318  ;;  %v937_v53 = vadd.f32 %v2105_v45, %v936_v19 }
 0x33b   : > { %v2110_v61 = vpop.eup %1320  ;;  %v938_v46 = vadd.f32 %v2107_v4, %v937_v53 }
 0x33c   : > { %v2113_v30 = vpop.eup %1322  ;;  %v2118_v47 = vmul.f32 %v2110_v61, %v1856_v35  ;;  %v2122_v40 = vmul.f32 %v2110_v61, %v1865_v20  ;;  %v2128_v50 = vmul.f32 %v2110_v61, %v1870_v44  ;;  %v2132_v37 = vmul.f32 %v2110_v61, %v1876_v13 }
 0x33d   : > { %v939_v62 = vadd.f32 %v2113_v30, %v938_v46  ;;  %v2124_v17 = vpop.eup %1324  ;;  %v2139_v53 = vmul.f32 %v2110_v61, %v1892_v60  ;;  %v2143_v20 = vmul.f32 %v2110_v61, %v1905_v5  ;;  %v2149_v13 = vmul.f32 %v2110_v61, %v1917_v59 }
 0x33e   : > { %v2153_v46 = vmul.f32 %v2110_v61, %v1929_v63  ;;  %v2163_v35 = vmul.f32 %v2110_v61, %v1953_v12  ;;  %v2167_v59 = vmul.f32 %v2110_v61, %v1965_v23  ;;  %v2173_v44 = vmul.f32 %v2110_v61, %v1977_v56 }
 0x33f   : > { %v940_v19 = vadd.f32 %v2124_v17, %v939_v62  ;;  %2518 = vst [vmem:[#allocation11_spill] sm:$0xff] %v2139_v53  ;;  %v2157_v62 = vmul.f32 %v2110_v61, %v1941_v25  ;;  %v2177_v25 = vmul.f32 %v2110_v61, %v1986_v22  ;;  %v2181_v5 = vmul.f32 %v2110_v61, %v1995_v6 }
 0x340   : > { %2520 = vst [vmem:[#allocation13_spill] sm:$0xff] %v2163_v35  ;;  %2521 = vst [vmem:[#allocation14_spill] sm:$0xff] %v2167_v59  ;;  %v2187_v53 = vmul.f32 %v2110_v61, %v2004_v9  ;;  %v2191_v56 = vmul.f32 %v2110_v61, %v2013_v33  ;;  %v2199_v6 = vmul.f32 %v2110_v61, %v2022_v36  ;;  %v2528_v35 = vld [vmem:[#allocation5_spill] sm:$0xff] }
 0x341   : > { %2519 = vst [vmem:[#allocation12_spill] sm:$0xff] %v2157_v62  ;;  %v941_v60 = vrot.slane %v940_v19, 4  ;;  %2522 = vst [vmem:[#allocation15_spill] sm:$0xff] %v2173_v44  ;;  %v2527_v44 = vld [vmem:[#allocation4_spill] sm:$0xff] }
 0x342   : > { %2523 = vst [vmem:[#allocation17_spill] sm:$0xff] %v2177_v25  ;;  %2524 = vst [vmem:[#allocation18_spill] sm:$0xff] %v2181_v5  ;;  %v2525_v25 = vld [vmem:[#allocation25_spill] sm:$0xff]  ;;  %v2526_v5 = vld [vmem:[#allocation26_spill] sm:$0xff]  ;;  %v953_v62 = vmul.f32 %v2110_v61, %v2527_v44 }
 0x343   : > { %v942_v12 = vadd.f32 %v941_v60, %v940_v19  ;;  %v2203_v19 = vmul.f32 %v2110_v61, %v2031_v42  ;;  %v949_v36 = vmul.f32 %v2110_v61, %v2525_v25  ;;  %v951_v42 = vmul.f32 %v2110_v61, %v2526_v5 }
 0x344   : > { %v955_v60 = vmul.f32 %v2110_v61, %v2528_v35 }
 0x345   : > { %v943_v9 = vrot.slane %v942_v12, 2  ;;  %v1015_v35 = vpack.c.bf16 %v951_v42, %v949_v36 }
 0x347   : > { %v944_v23 = vadd.f32 %v943_v9, %v942_v12  ;;  %v2529_v9 = vld [vmem:[#allocation6_spill] sm:$0xff] }
 0x349   : > { %v945_v22 = vrot.slane %v944_v23, 1 }
 0x34b   : > { %v946_v59 = vadd.f32 %v945_v22, %v944_v23 }
 0x34d   : > { %1326 = vrcp.f32 %v946_v59 }
 0x357   : > { %v2209_v63 = vpop.eup %1326 }
 0x358   : > { %v950_v12 = vmul.f32 %v2209_v63, %v1881_v52  ;;  %v952_v59 = vmul.f32 %v2209_v63, %v1887_v21  ;;  %v954_v23 = vmul.f32 %v2209_v63, %v1900_v39  ;;  %v956_v25 = vmul.f32 %v2209_v63, %v1912_v2 }
 0x359   : > { %v958_v5 = vmul.f32 %v2209_v63, %v1924_v34  ;;  %v960_v44 = vmul.f32 %v2209_v63, %v1936_v15  ;;  %v957_v52 = vmul.f32 %v2110_v61, %v2529_v9  ;;  %v959_v21 = vmul.f32 %v2110_v61, %v1781_v31 }
 0x35a   : > { %v1016_v22 = vpack.c.bf16 %v952_v59, %v950_v12  ;;  %v961_v39 = vmul.f32 %v2110_v61, %v1790_v38  ;;  %v1018_v33 = vpack.c.bf16 %v956_v25, %v954_v23  ;;  %v1017_v2 = vpack.c.bf16 %v955_v60, %v953_v62 }
 0x35b   : > { %v962_v12 = vmul.f32 %v2209_v63, %v1948_v29  ;;  %v2241_v34 = vmul.f32 %v2209_v63, %v2026_v51  ;;  %v964_v15 = vmul.f32 %v2209_v63, %v1960_v10  ;;  %v980_v31 = vmul.f32 %v2209_v63, %v2035_v8 }
 0x35c   : > { %1047 = vmatprep.subr.bf16.mxu0 %v1016_v22  ;;  %v982_v38 = vmul.f32 %v2209_v63, %v2042_v7  ;;  %v984_v62 = vmul.f32 %v2209_v63, %v2048_v0  ;;  %v1020_v60 = vpack.c.bf16 %v960_v44, %v958_v5  ;;  %v986_v29 = vmul.f32 %v2209_v63, %v2054_v58 }
 0x35d   : > { %1048 = vmatpush1.bf16.msra.mxu0 %v1015_v35  ;;  %v988_v51 = vmul.f32 %v2209_v63, %v2060_v54  ;;  %v990_v10 = vmul.f32 %v2209_v63, %v2066_v16  ;;  %v1030_v36 = vpack.c.bf16 %v980_v31, %v2241_v34  ;;  %v992_v7 = vmul.f32 %v2209_v63, %v2072_v26  ;;  %v2533_v31 = vld [vmem:[#allocation8_spill] sm:$0xff] }
 0x35e   : > { %1049 = vmatprep.subr.bf16.mxu0 %v1018_v33  ;;  %v1032_v8 = vpack.c.bf16 %v984_v62, %v982_v38  ;;  %v994_v0 = vmul.f32 %v2209_v63, %v2081_v43  ;;  %v996_v42 = vmul.f32 %v2209_v63, %v2084_v48  ;;  %v998_v58 = vmul.f32 %v2209_v63, %v2090_v11 }
 0x35f   : > { %v1034_v33 = vpack.c.bf16 %v988_v51, %v986_v29  ;;  %v1000_v54 = vmul.f32 %v2209_v63, %v2096_v28  ;;  %v1036_v16 = vpack.c.bf16 %v992_v7, %v990_v10  ;;  %v1002_v59 = vmul.f32 %v2209_v63, %v2099_v32  ;;  %v2550_v7 = vld [vmem:[#allocation3_spill] sm:$0xff] }
 0x360   : > { %v1004_v26 = vmul.f32 %v2209_v63, %v2102_v27  ;;  %v1006_v43 = vmul.f32 %v2209_v63, %v2105_v45  ;;  %v1038_v23 = vpack.c.bf16 %v996_v42, %v994_v0  ;;  %v1008_v11 = vmul.f32 %v2209_v63, %v2107_v4  ;;  %v2551_v0 = vld [vmem:[#allocation2_spill] sm:$0xff] }
 0x361   : > { %1050 = vmatpush1.bf16.msra.mxu0 %v1017_v2  ;;  %v1040_v48 = vpack.c.bf16 %v1000_v54, %v998_v58  ;;  %v1010_v28 = vmul.f32 %v2209_v63, %v2113_v30  ;;  %v1019_v25 = vpack.c.bf16 %v959_v21, %v957_v52  ;;  %v963_v22 = vmul.f32 %v2110_v61, %v1796_v41  ;;  %v2530_v2 = vld [vmem:[#allocation9_spill] sm:$0xff]  ;;  %v1328_v58 = vld [vmem:[%s1386_s21] sm:$0xff] }
 0x362   : > { %1051 = vmatprep.subr.bf16.mxu0 %v1020_v60  ;;  %v1042_v32 = vpack.c.bf16 %v1004_v26, %v1002_v59  ;;  %v1012_v27 = vmul.f32 %v2209_v63, %v2124_v17  ;;  %v1022_v5 = vpack.c.bf16 %v964_v15, %v962_v12  ;;  %v966_v45 = vmul.f32 %v2209_v63, %v1972_v55  ;;  %v2531_v12 = vld [vmem:[#allocation10_spill] sm:$0xff]  ;;  %v2536_v60 = vld [vmem:[#allocation11_spill] sm:$0xff] }
 0x363   : > { %v968_v44 = vmul.f32 %v2209_v63, %v1981_v1  ;;  %v1044_v35 = vpack.c.bf16 %v1008_v11, %v1006_v43  ;;  %v1021_v30 = vpack.c.bf16 %v963_v22, %v961_v39  ;;  %v965_v9 = vmul.f32 %v2110_v61, %v1802_v3  ;;  %v1331_v43 = vld [vmem:[%s1386_s21 + $0x18] sm:$0xff] }
 0x364   : > { %v1046_v4 = vpack.c.bf16 %v1012_v27, %v1010_v28  ;;  %v967_v41 = vmul.f32 %v2110_v61, %v1811_v57  ;;  %v970_v17 = vmul.f32 %v2209_v63, %v1990_v18  ;;  %v972_v55 = vmul.f32 %v2209_v63, %v1999_v24  ;;  %v2532_v24 = vld [vmem:[#allocation7_spill] sm:$0xff] }
 0x365   : > { %1052 = vmatpush1.bf16.msra.mxu0 %v1019_v25  ;;  %v1024_v52 = vpack.c.bf16 %v968_v44, %v966_v45  ;;  %v969_v21 = vmul.f32 %v2110_v61, %v1820_v49  ;;  %v971_v39 = vmul.f32 %v2110_v61, %v1829_v14  ;;  %v974_v57 = vmul.f32 %v2209_v63, %v2530_v2 }
 0x366   : > { %1053 = vmatprep.subr.bf16.mxu0 %v1022_v5  ;;  %v1023_v1 = vpack.c.bf16 %v967_v41, %v965_v9  ;;  %v1026_v3 = vpack.c.bf16 %v972_v55, %v970_v17  ;;  %v976_v34 = vmul.f32 %v2209_v63, %v2531_v12  ;;  %v973_v15 = vmul.f32 %v2110_v61, %v2532_v24 }
 0x367   : > { %v1025_v18 = vpack.c.bf16 %v971_v39, %v969_v21  ;;  %v975_v38 = vmul.f32 %v2110_v61, %v2533_v31  ;;  %v2534_v62 = vpack.c.bf16 %v2122_v40, %v2118_v47  ;;  %v2535_v63 = vpack.c.bf16 %v2132_v37, %v2128_v50  ;;  %v2539_v47 = vld [vmem:[#allocation13_spill] sm:$0xff]  ;;  %v2540_v40 = vld [vmem:[#allocation12_spill] sm:$0xff]  ;;  %v2542_v50 = vld [vmem:[#allocation15_spill] sm:$0xff] }
 0x368   : > { %v1028_v49 = vpack.c.bf16 %v976_v34, %v974_v57  ;;  %v2537_v61 = vpack.c.bf16 %v2143_v20, %v2536_v60  ;;  %v2538_v29 = vpack.c.bf16 %v2153_v46, %v2149_v13  ;;  %v2541_v51 = vpack.c.bf16 %v2539_v47, %v2540_v40  ;;  %v2543_v37 = vld [vmem:[#allocation14_spill] sm:$0xff] }
 0x369   : > { %1054 = vmatpush1.bf16.msra.mxu0 %v1021_v30  ;;  %v1027_v14 = vpack.c.bf16 %v975_v38, %v973_v15  ;;  %v2544_v10 = vpack.c.bf16 %v2542_v50, %v2543_v37  ;;  %v2545_v20 = vld [vmem:[#allocation18_spill] sm:$0xff]  ;;  %v2548_v13 = vpack.c.bf16 %v2191_v56, %v2187_v53  ;;  %v2549_v46 = vpack.c.bf16 %v2203_v19, %v2199_v6  ;;  %v1329_v56 = vld [vmem:[%s1386_s21 + $0x8] sm:$0xff]  ;;  %v1330_v6 = vld [vmem:[%s1386_s21 + $0x10] sm:$0xff] }
 0x36a   : > { %1055 = vmatprep.subr.bf16.mxu0 %v1024_v52 }
 0x36d   : > { %1056 = vmatpush1.bf16.msra.mxu0 %v1023_v1 }
 0x36e   : > { %1057 = vmatprep.subr.bf16.mxu0 %v1026_v3 }
 0x371   : > { %1058 = vmatpush1.bf16.msra.mxu0 %v1025_v18 }
 0x372   : > { %1059 = vmatprep.subr.bf16.mxu0 %v1028_v49 }
 0x375   : > { %1060 = vmatpush1.bf16.msra.mxu0 %v1027_v14 }
 0x376   : > { %1061 = vmatprep.subr.bf16.mxu0 %v1030_v36  ;;  %v2546_v36 = vld [vmem:[#allocation17_spill] sm:$0xff] }
 0x379   : > { %1062 = vmatpush1.bf16.msra.mxu0 %v2534_v62 }
 0x37a   : > { %1063 = vmatprep.subr.bf16.mxu0 %v1032_v8  ;;  %v2547_v8 = vpack.c.bf16 %v2545_v20, %v2546_v36 }
 0x37d   : > { %1064 = vmatpush1.bf16.msra.mxu0 %v2535_v63 }
 0x37e   : > { %1065 = vmatprep.subr.bf16.mxu0 %v1034_v33  ;;  %v2552_v33 = vpack.c.bf16 %v2550_v7, %v2551_v0 }
 0x381   : > { %1066 = vmatpush1.bf16.msra.mxu0 %v2537_v61 }
 0x382   : > { %1067 = vmatprep.subr.bf16.mxu0 %v1036_v16 }
 0x385   : > { %1068 = vmatpush1.bf16.msra.mxu0 %v2538_v29 }
 0x386   : > { %1069 = vmatprep.subr.bf16.mxu0 %v1038_v23 }
 0x389   : > { %1070 = vmatpush1.bf16.msra.mxu0 %v2541_v51 }
 0x38a   : > { %1071 = vmatprep.subr.bf16.mxu0 %v1040_v48 }
 0x38d   : > { %1072 = vmatpush1.bf16.msra.mxu0 %v2544_v10 }
 0x38e   : > { %1073 = vmatprep.subr.bf16.mxu0 %v1042_v32 }
 0x391   : > { %1074 = vmatpush1.bf16.msra.mxu0 %v2547_v8 }
 0x392   : > { %1075 = vmatprep.subr.bf16.mxu0 %v1044_v35 }
 0x395   : > { %1076 = vmatpush1.bf16.msra.mxu0 %v2548_v13 }
 0x396   : > { %1077 = vmatprep.subr.bf16.mxu0 %v1046_v4 }
 0x399   : > { %1078 = vmatpush1.bf16.msra.mxu0 %v2549_v46 }
 0x39c   : > { %1080 = vmatmul.mubr.bf16.vlgmr.msra.gmra.mrb[8].mxu0 %v2552_v33 }
 0x46f   : > { %v1081_v42 = vpop.f32.mrb[8].mxu0 }
 0x470   : > { %v1082_v54 = vadd.f32 %v1328_v58, %v1081_v42  ;;  %v1083_v53 = vpop.f32.mrb[9].mxu0 }
 0x471   : > { %v1084_v16 = vadd.f32 %v1329_v56, %v1083_v53  ;;  %v1085_v59 = vpop.f32.mrb[10].mxu0 }
 0x472   : > { %1090 = vst [vmem:[%s170_s5] sm:$0xff] %v1082_v54  ;;  %v1086_v19 = vadd.f32 %v1330_v6, %v1085_v59  ;;  %v1087_v26 = vpop.f32.mrb[11].mxu0 }
 0x473   : > { %1091 = vst [vmem:[%s170_s5 + $0x8] sm:$0xff] %v1084_v16  ;;  %v1088_v23 = vadd.f32 %v1331_v43, %v1087_v26 }
 0x474   : > { %1092 = vst [vmem:[%s170_s5 + $0x10] sm:$0xff] %v1086_v19 }
 0x475   : > { %1093 = vst [vmem:[%s170_s5 + $0x18] sm:$0xff] %v1088_v23 }
 0x476 PF: > { %s13_s12 = sadd.s32 1, %s1338_s12  }
 0x477   : > { %p10_p4 = scmp.ge.s32.totalorder %s13_s12, 4  }
 0x479   :  { %12 = sbr.rel (!%p10_p4) target bundleno = 1 (0x1), region = 62 }

</bundles_post_ra>
